<compile_context>
chip_gen: v6e
topology: v6e:2x2x1
jax: 0.10.0
libtpu: 0.0.40
codegen_flags: <defaults>
</compile_context>

<pallas_src>
import functools

import jax
import jax.numpy as jnp
from jax import lax
from jax.experimental import pallas as pl
from jax.experimental.pallas import tpu as pltpu


def mlp_kernel(x_ref, w1_ref, b1_ref, w2_ref, b2_ref, w3_ref, b3_ref, o_ref, *, chunk):
    """One batch tile: x_ref (1, TB) -> o_ref (1, TB). Batch on lanes, chunked loop inside."""
    tb = x_ref.shape[1]
    n_chunks = tb // chunk                      # static
    b3 = b3_ref[0, 0]                           # scalar bias (SMEM)

    def body(c, carry):
        start = pl.multiple_of(c * chunk, chunk)
        x = x_ref[:, pl.ds(start, chunk)]                       # (1, chunk) f32
        xb = jnp.broadcast_to(x, (128, chunk))                  # per-chunk sublane broadcast

        # dense1 + relu. K == 1 -> rank-1 broadcast multiply: pure VPU work.
        # w1/b1 are pre-broadcast along lanes, so no per-vreg lane broadcasts here.
        h1 = jnp.maximum(w1_ref[...] * xb + b1_ref[...], 0.0)   # (128, chunk) f32

        # dense2 + relu: the only real matmul -> MXU. h1 cast to the weight dtype
        # (bf16 by default) right at the dot; accumulation stays f32, all
        # elementwise math stays f32 (v5e-safe).
        h2 = jnp.dot(w2_ref[...], h1.astype(w2_ref.dtype),
                     preferred_element_type=jnp.float32)        # (64, chunk) f32
        h2 = jnp.maximum(h2 + b2_ref[...], 0.0)

        # dense3. N == 1 -> weighted sublane reduce (VPU mul + XLU reduce).
        # TODO(synk): if bundle dumps show the XLU/extended slot binds on v6e/v7x,
        # move this reduce onto the MXU as a (1,64)x(64,chunk) dot instead.
        out = jnp.sum(w3_ref[...] * h2, axis=0, keepdims=True) + b3    # (1, chunk)
        o_ref[:, pl.ds(start, chunk)] = out.astype(o_ref.dtype)
        return carry

    lax.fori_loop(0, n_chunks, body, 0, unroll=True)


def mlp_forward(x, w1, b1, w2, b2, w3, b3, *, tb=2048, chunk=256, bf16_matmul=True):
    """model2 forward. x: (B, 1) f32. Params in PyTorch nn.Linear [out, in] layout.

    chunk: lane width of the in-kernel sub-tiles (256 matches the v6e/v7x MXU;
    use 128 on v5e).  bf16_matmul: bf16 inputs to the dense2 dot (default; the
    MXU is bf16-native on all generations) -- set False for an exact f32 path.
    """
    B, in_features = x.shape
    assert in_features == 1 and w1.shape == (128, 1), "kernel assumes input_size == 1"
    assert w2.shape == (64, 128) and w3.shape == (1, 64), "kernel assumes 128 -> 64 -> 1"
    assert chunk % 128 == 0

    # Tile size: multiple of the lane chunk.  Large default amortizes the
    # ~0.35 us per-grid-step overhead; keep >= 2 grid steps whenever there is
    # more than one chunk of work so the "parallel" axis feeds both v7x TCs.
    tb = max(chunk, (tb // chunk) * chunk)
    bp_min = pl.cdiv(B, chunk) * chunk
    n_chunks_total = bp_min // chunk
    if n_chunks_total >= 2:
        tb = min(tb, pl.cdiv(n_chunks_total, 2) * chunk)
    else:
        tb = chunk
    bp = pl.cdiv(bp_min, tb) * tb
    grid = (bp // tb,)

    # Batch along lanes, zero-padded up to a tile multiple (padded lanes are
    # computed but independent and sliced off afterwards).
    xt = jnp.pad(x[:, 0].astype(jnp.float32), (0, bp - B)).reshape(1, bp)

    mm_dtype = jnp.bfloat16 if bf16_matmul else jnp.float32

    # Params pre-broadcast along lanes (DMA'd once; constant index_map keeps them
    # VMEM-resident across the batch grid). ~0.4 MiB total -- negligible VMEM.
    w1c = jnp.broadcast_to(w1.astype(jnp.float32).reshape(128, 1), (128, chunk))
    b1c = jnp.broadcast_to(b1.astype(jnp.float32).reshape(128, 1), (128, chunk))
    w2m = w2.astype(mm_dtype)                                              # (64, 128)
    b2c = jnp.broadcast_to(b2.astype(jnp.float32).reshape(64, 1), (64, chunk))
    w3c = jnp.broadcast_to(w3.astype(jnp.float32).reshape(1, 64).T, (64, chunk))
    b3s = b3.astype(jnp.float32).reshape(1, 1)                             # SMEM scalar

    resident = lambda i: (0, 0)  # same block every step -> stays in VMEM

    out_t = pl.pallas_call(
        functools.partial(mlp_kernel, chunk=chunk),
        out_shape=jax.ShapeDtypeStruct((1, bp), jnp.float32),
        grid=grid,
        in_specs=[
            pl.BlockSpec((1, tb), lambda i: (0, i)),             # x batch tile
            pl.BlockSpec((128, chunk), resident),                # dense1.weight (lane-broadcast)
            pl.BlockSpec((128, chunk), resident),                # dense1.bias   (lane-broadcast)
            pl.BlockSpec((64, 128), resident),                   # dense2.weight
            pl.BlockSpec((64, chunk), resident),                 # dense2.bias   (lane-broadcast)
            pl.BlockSpec((64, chunk), resident),                 # dense3.weight (lane-broadcast)
            pl.BlockSpec(memory_space=pltpu.MemorySpace.SMEM),   # dense3.bias scalar
        ],
        out_specs=pl.BlockSpec((1, tb), lambda i: (0, i)),
        compiler_params=pltpu.CompilerParams(
            dimension_semantics=("parallel",),                   # megacore / dual-TC batch split
        ),
    )(xt, w1c, b1c, w2m, b2c, w3c, b3s)

    return out_t[0, :B].reshape(B, 1)


def init_params(key, input_size=1, output_size=1):
    """PyTorch nn.Linear layout: weight [out, in], bias [out]; U(+-1/sqrt(fan_in))."""
    sizes = [(input_size, 128), (128, 64), (64, output_size)]
    params = []
    for fan_in, fan_out in sizes:
        key, kw, kb = jax.random.split(key, 3)
        bound = 1.0 / jnp.sqrt(float(fan_in))
        params.append(jax.random.uniform(kw, (fan_out, fan_in), jnp.float32, -bound, bound))
        params.append(jax.random.uniform(kb, (fan_out,), jnp.float32, -bound, bound))
    return tuple(params)


def reference_forward(x, w1, b1, w2, b2, w3, b3):
    h1 = jnp.maximum(x @ w1.T + b1, 0.0)
    h2 = jnp.maximum(h1 @ w2.T + b2, 0.0)
    return h2 @ w3.T + b3


if __name__ == "__main__":
    key = jax.random.PRNGKey(0)
    key, kx = jax.random.split(key)
    batch, input_size = 8, 1
    x = jax.random.normal(kx, (batch, input_size), jnp.float32)
    params = init_params(key, input_size=input_size, output_size=1)
    ref = reference_forward(x, *params)

    # Small batch (module's typical use): single tile, exact f32 MXU path.
    out_f32 = jax.block_until_ready(mlp_forward(x, *params, bf16_matmul=False))
    assert out_f32.shape == (batch, 1)
    assert jnp.allclose(out_f32, ref, atol=1e-5, rtol=1e-5)

    # Default path: bf16 at the dot (MXU-native on v5e/v6e/v7x).
    out_bf16 = jax.block_until_ready(mlp_forward(x, *params))
    assert jnp.allclose(out_bf16, ref, atol=5e-2, rtol=5e-2)

    # Larger, non-tile-multiple batch exercising the multi-step "parallel" grid
    # (>= 2 steps so both v7x TensorCores get work) and the chunked inner loop.
    xb = jax.random.normal(jax.random.PRNGKey(1), (1000, 1), jnp.float32)
    refb = reference_forward(xb, *params)
    outb = jax.block_until_ready(mlp_forward(xb, *params))
    assert outb.shape == (1000, 1)
    assert jnp.allclose(outb, refb, atol=5e-2, rtol=5e-2)
    outb_f32 = jax.block_until_ready(mlp_forward(xb, *params, bf16_matmul=False))
    assert jnp.allclose(outb_f32, refb, atol=1e-4, rtol=1e-4)

    # v5e-style variant: 128-lane chunks.
    outb_128 = jax.block_until_ready(mlp_forward(xb, *params, chunk=128))
    assert jnp.allclose(outb_128, refb, atol=5e-2, rtol=5e-2)

    print("KERNEL_OK")
</pallas_src>

<mosaic_0001>
module attributes {stable_mosaic.version = 11 : i64} {
  func.func @mlp_kernel(%arg0: i32, %arg1: memref<1x256xf32, #tpu.memory_space<vmem>>, %arg2: memref<128x256xf32, #tpu.memory_space<vmem>>, %arg3: memref<128x256xf32, #tpu.memory_space<vmem>>, %arg4: memref<64x128xf32, #tpu.memory_space<vmem>>, %arg5: memref<64x256xf32, #tpu.memory_space<vmem>>, %arg6: memref<64x256xf32, #tpu.memory_space<vmem>>, %arg7: memref<1x1xf32, #tpu.memory_space<smem>>, %arg8: memref<1x256xf32, #tpu.memory_space<vmem>>) attributes {dimension_semantics = [#tpu.dimension_semantics<parallel>], iteration_bounds = array<i64: 1>, scalar_prefetch = 0 : i64, scratch_operands = 0 : i64, tpu.core_type = #tpu.core_type<tc>, window_params = [{transform_indices = @transform_0, window_bounds = array<i64: 1, 256>}, {pipeline_mode = #tpu.pipeline_mode<synchronous>, transform_indices = @transform_1, window_bounds = array<i64: 128, 256>}, {pipeline_mode = #tpu.pipeline_mode<synchronous>, transform_indices = @transform_2, window_bounds = array<i64: 128, 256>}, {pipeline_mode = #tpu.pipeline_mode<synchronous>, transform_indices = @transform_3, window_bounds = array<i64: 64, 128>}, {pipeline_mode = #tpu.pipeline_mode<synchronous>, transform_indices = @transform_4, window_bounds = array<i64: 64, 256>}, {pipeline_mode = #tpu.pipeline_mode<synchronous>, transform_indices = @transform_5, window_bounds = array<i64: 64, 256>}, {transform_indices = @transform_6, window_bounds = array<i64: 1, 1>}, {transform_indices = @transform_7, window_bounds = array<i64: 1, 256>}]} {
    %c0 = arith.constant 0 : index
    %c0_0 = arith.constant 0 : index
    %0 = memref.load %arg7[%c0, %c0_0] : memref<1x1xf32, #tpu.memory_space<smem>>
    %c0_i32 = arith.constant 0 : i32
    %c256_i32 = arith.constant 256 : i32
    %1 = arith.muli %c0_i32, %c256_i32 : i32
    %2 = tpu.assume_multiple %1, 256 : i32
    %c0_1 = arith.constant 0 : index
    %3 = arith.index_cast %2 : i32 to index
    %4 = vector.load %arg1[%c0_1, %3] : memref<1x256xf32, #tpu.memory_space<vmem>>, vector<1x256xf32>
    %5 = vector.shape_cast %4 : vector<1x256xf32> to vector<1x256xf32>
    %6 = vector.broadcast %5 : vector<1x256xf32> to vector<128x256xf32>
    %c0_2 = arith.constant 0 : index
    %c0_3 = arith.constant 0 : index
    %7 = vector.load %arg2[%c0_2, %c0_3] : memref<128x256xf32, #tpu.memory_space<vmem>>, vector<128x256xf32>
    %8 = arith.mulf %7, %6 : vector<128x256xf32>
    %c0_4 = arith.constant 0 : index
    %c0_5 = arith.constant 0 : index
    %9 = vector.load %arg3[%c0_4, %c0_5] : memref<128x256xf32, #tpu.memory_space<vmem>>, vector<128x256xf32>
    %10 = arith.addf %8, %9 : vector<128x256xf32>
    %cst = arith.constant 0.000000e+00 : f32
    %11 = vector.broadcast %cst : f32 to vector<128x256xf32>
    %12 = arith.maximumf %10, %11 : vector<128x256xf32>
    %c0_6 = arith.constant 0 : index
    %c0_7 = arith.constant 0 : index
    %13 = vector.load %arg4[%c0_6, %c0_7] : memref<64x128xf32, #tpu.memory_space<vmem>>, vector<64x128xf32>
    %cst_8 = arith.constant dense<0.000000e+00> : vector<64x256xf32>
    %14 = tpu.matmul %13, %12, %cst_8 {dimension_numbers = #tpu.dot_dimension_numbers<[1], [0], [0], [1], [0, 0, 1, 1], [], []>} : vector<64x128xf32>, vector<128x256xf32>, vector<64x256xf32> -> vector<64x256xf32>
    %c0_9 = arith.constant 0 : index
    %c0_10 = arith.constant 0 : index
    %15 = vector.load %arg5[%c0_9, %c0_10] : memref<64x256xf32, #tpu.memory_space<vmem>>, vector<64x256xf32>
    %16 = arith.addf %14, %15 : vector<64x256xf32>
    %cst_11 = arith.constant 0.000000e+00 : f32
    %17 = vector.broadcast %cst_11 : f32 to vector<64x256xf32>
    %18 = arith.maximumf %16, %17 : vector<64x256xf32>
    %c0_12 = arith.constant 0 : index
    %c0_13 = arith.constant 0 : index
    %19 = vector.load %arg6[%c0_12, %c0_13] : memref<64x256xf32, #tpu.memory_space<vmem>>, vector<64x256xf32>
    %20 = arith.mulf %19, %18 : vector<64x256xf32>
    %cst_14 = arith.constant dense<0.000000e+00> : vector<256xf32>
    %21 = vector.multi_reduction <add>, %20, %cst_14 [0] : vector<64x256xf32> to vector<256xf32>
    %22 = vector.shape_cast %21 : vector<256xf32> to vector<1x256xf32>
    %23 = vector.broadcast %0 : f32 to vector<1x256xf32>
    %24 = arith.addf %22, %23 : vector<1x256xf32>
    %c0_15 = arith.constant 0 : index
    %25 = arith.index_cast %2 : i32 to index
    %26 = vector.load %arg8[%c0_15, %25] : memref<1x256xf32, #tpu.memory_space<vmem>>, vector<1x256xf32>
    tpu.vector_store %arg8[%c0_15, %25], %24 {strides = array<i32>} : memref<1x256xf32, #tpu.memory_space<vmem>>, vector<1x256xf32>,
    %c1_i32 = arith.constant 1 : i32
    return
  }
  func.func @transform_0(%arg0: i32) -> (i32, i32) {
    %c0_i32 = arith.constant 0 : i32
    %c0_i32_0 = arith.constant 0 : i32
    return %c0_i32, %arg0 : i32, i32
  }
  func.func @transform_1(%arg0: i32) -> (i32, i32) {
    %c0_i32 = arith.constant 0 : i32
    %c0_i32_0 = arith.constant 0 : i32
    %c0_i32_1 = arith.constant 0 : i32
    return %c0_i32, %c0_i32_0 : i32, i32
  }
  func.func @transform_2(%arg0: i32) -> (i32, i32) {
    %c0_i32 = arith.constant 0 : i32
    %c0_i32_0 = arith.constant 0 : i32
    %c0_i32_1 = arith.constant 0 : i32
    return %c0_i32, %c0_i32_0 : i32, i32
  }
  func.func @transform_3(%arg0: i32) -> (i32, i32) {
    %c0_i32 = arith.constant 0 : i32
    %c0_i32_0 = arith.constant 0 : i32
    %c0_i32_1 = arith.constant 0 : i32
    return %c0_i32, %c0_i32_0 : i32, i32
  }
  func.func @transform_4(%arg0: i32) -> (i32, i32) {
    %c0_i32 = arith.constant 0 : i32
    %c0_i32_0 = arith.constant 0 : i32
    %c0_i32_1 = arith.constant 0 : i32
    return %c0_i32, %c0_i32_0 : i32, i32
  }
  func.func @transform_5(%arg0: i32) -> (i32, i32) {
    %c0_i32 = arith.constant 0 : i32
    %c0_i32_0 = arith.constant 0 : i32
    %c0_i32_1 = arith.constant 0 : i32
    return %c0_i32, %c0_i32_0 : i32, i32
  }
  func.func @transform_6(%arg0: i32) -> (i32, i32) {
    %c0_i32 = arith.constant 0 : i32
    %c0_i32_0 = arith.constant 0 : i32
    %c0_i32_1 = arith.constant 0 : i32
    return %c0_i32, %c0_i32_0 : i32, i32
  }
  func.func @transform_7(%arg0: i32) -> (i32, i32) {
    %c0_i32 = arith.constant 0 : i32
    %c0_i32_0 = arith.constant 0 : i32
    return %c0_i32, %arg0 : i32, i32
  }
}

</mosaic_0001>

<bundles_post_ra>
// kernel: tpu_custom_call.1
= control target key start
LH: loop header
LB: loop body
LE: loop exit
PB: predicated region body
PF: predicated region fallthrough
CT: control target
= control target key end

     0   :  { %13 = vsyncpa [#allocation4], 0  ;;  %s834_s0 = inlined_call_operand.vmem [shape: f32[1,256], index: 0, kind: input, shape index: {}]   ;;  %s835_s1 = inlined_call_operand.hbm [shape: f32[128,256], index: 1, kind: input, shape index: {}]   ;;  %s836_s2 = inlined_call_operand.hbm [shape: f32[128,256], index: 2, kind: input, shape index: {}]   ;;  %s837_s3 = inlined_call_operand.hbm [shape: f32[64,128], index: 3, kind: input, shape index: {}]   ;;  %s838_s4 = inlined_call_operand.hbm [shape: f32[64,256], index: 4, kind: input, shape index: {}]   ;;  %s839_s5 = inlined_call_operand.hbm [shape: f32[64,256], index: 5, kind: input, shape index: {}]   ;;  %s840_s6 = inlined_call_operand.<no memory space> [shape: f32[1,1], index: 6, kind: input, shape index: {}]   ;;  %s841_s7 = inlined_call_operand.hbm [shape: f32[1,256], index: 7, kind: output, shape index: {}]  }
   0x1   :  { %14 = vsyncpa [#allocation7], 0 }
   0x2   :  { %15 = vsyncpa [#allocation10], 0 }
   0x3   :  { %16 = vsyncpa [#allocation5], 0  ;;  %s695_s24 = smov [#allocation6]   ;;  %s696_s26 = smov [#allocation9]  }
   0x4   :  { %s36_s25 = sshll.u32 %s695_s24, 4  ;;  %s60_s27 = sshll.u32 %s696_s26, 4  ;;  %s37_s25 = int_to_ptr.vmem [resolvable:$true] %s36_s25  ;;  %s61_s27 = int_to_ptr.vmem [resolvable:$true] %s60_s27 }
   0x5   :  { %s575_s28 = scalar_lea.vmem %s37_s25, 4096  ;;  %p580_p1 = scmp.lt.s32.totalorder %s37_s25, %s37_s25 }
   0x6   :  { %p576_p0 = scmp.ne.s32.totalorder %s37_s25, %s575_s28  ;;  %p581_p2 = scmp.lt.s32.totalorder %s575_s28, %s575_s28 }
   0x8   :  { %p582_p3 = por %p581_p2, %p580_p1 }
   0xa   :  { %p583_p4 = pnand %p582_p3, %p576_p0 }
   0xc   :  { %586 = shalt.err (!%p583_p4)
}
   0xd   :  { %s697_s29 = smov 256   ;;  %s698_s30 = smov 16  }
   0xe   :  { %42 = dma.hbm_to_vmem [thread:$0]  %s836_s2, 4096, %s37_s25, [#allocation7], %s697_s29, %s697_s29, %s698_s30  }
   0xf   :  { %s595_s10 = scalar_lea.vmem %s61_s27, 2048  ;;  %p600_p6 = scmp.lt.s32.totalorder %s61_s27, %s61_s27 }
  0x10   :  { %p596_p5 = scmp.ne.s32.totalorder %s61_s27, %s595_s10  ;;  %p601_p7 = scmp.lt.s32.totalorder %s595_s10, %s595_s10 }
  0x12   :  { %p602_p8 = por %p601_p7, %p600_p6 }
  0x14   :  { %p603_p9 = pnand %p602_p8, %p596_p5 }
  0x16   :  { %606 = shalt.err (!%p603_p9)
}
  0x17   :  { %66 = dma.hbm_to_vmem [thread:$0]  %s838_s4, 2048, %s61_s27, [#allocation10], %s697_s29, %s697_s29, %s698_s30  }
  0x18   :  { %s699_s13 = smov [#allocation3]   ;;  %s700_s15 = smov [#allocation8]  }
  0x19   :  { %s24_s14 = sshll.u32 %s699_s13, 4  ;;  %s48_s16 = sshll.u32 %s700_s15, 4  ;;  %s25_s14 = int_to_ptr.vmem [resolvable:$true] %s24_s14  ;;  %s49_s16 = int_to_ptr.vmem [resolvable:$true] %s48_s16 }
  0x1a   :  { %s615_s2 = scalar_lea.vmem %s25_s14, 4096  ;;  %p620_p11 = scmp.lt.s32.totalorder %s25_s14, %s25_s14 }
  0x1b   :  { %p616_p10 = scmp.ne.s32.totalorder %s25_s14, %s615_s2  ;;  %p621_p12 = scmp.lt.s32.totalorder %s615_s2, %s615_s2 }
  0x1d   :  { %p622_p13 = por %p621_p12, %p620_p11 }
  0x1f   :  { %p623_p0 = pnand %p622_p13, %p616_p10 }
  0x21   :  { %626 = shalt.err (!%p623_p0)
}
  0x22   :  { %30 = dma.hbm_to_vmem [thread:$0]  %s835_s1, 4096, %s25_s14, [#allocation4], %s697_s29, %s697_s29, %s698_s30  }
  0x23   :  { %s635_s4 = scalar_lea.vmem %s49_s16, 1024  ;;  %p640_p2 = scmp.lt.s32.totalorder %s49_s16, %s49_s16 }
  0x24   :  { %p636_p1 = scmp.ne.s32.totalorder %s49_s16, %s635_s4  ;;  %p641_p3 = scmp.lt.s32.totalorder %s635_s4, %s635_s4 }
  0x26   :  { %p642_p4 = por %p641_p3, %p640_p2 }
  0x28   :  { %p643_p5 = pnand %p642_p4, %p636_p1 }
  0x2a   :  { %646 = shalt.err (!%p643_p5)
}
  0x2b   :  { %s701_s19 = smov 128   ;;  %s702_s20 = smov 8  }
  0x2c   :  { %54 = dma.hbm_to_vmem [thread:$0]  %s837_s3, 1024, %s49_s16, [#allocation7], %s701_s19, %s701_s19, %s702_s20  }
  0x2d   :  { %s703_s23 = smov [#allocation11]  }
  0x2e   :  { %s72_s24 = sshll.u32 %s703_s23, 4  ;;  %s73_s24 = int_to_ptr.vmem [resolvable:$true] %s72_s24 }
  0x2f   :  { %s655_s25 = scalar_lea.vmem %s73_s24, 2048  ;;  %p660_p7 = scmp.lt.s32.totalorder %s73_s24, %s73_s24 }
  0x30   :  { %p656_p6 = scmp.ne.s32.totalorder %s73_s24, %s655_s25  ;;  %p661_p8 = scmp.lt.s32.totalorder %s655_s25, %s655_s25 }
  0x32   :  { %p662_p9 = por %p661_p8, %p660_p7 }
  0x34   :  { %p663_p10 = pnand %p662_p9, %p656_p6 }
  0x36   :  { %666 = shalt.err (!%p663_p10)
}
  0x37   :  { %78 = dma.hbm_to_vmem [thread:$0]  %s839_s5, 2048, %s73_s24, [#allocation10], %s697_s29, %s697_s29, %s698_s30  }
  0x38   :  { %687 = dma.done.wait [#allocation4], 4096  }
  0x39   :  { %688 = vsyncadd [#allocation4], 4294963200 }
  0x3a   :  { %689 = dma.done.wait [#allocation7], 5120  }
  0x3b   :  { %690 = vsyncadd [#allocation7], 4294962176 }
  0x3c   :  { %691 = dma.done.wait [#allocation10], 4096  }
  0x3d   :  { %692 = vsyncadd [#allocation10], 4294963200  ;;  %v99_v0 = vlaneseq  ;;  %v704_v1 = vmov 0.0   ;;  %v97_v5 = vld [vmem:[%s834_s0] sm:$0x3]  ;;  %v140_v6 = vld [vmem:[#allocation3 + $0xf8] sm:$0xff] }
  0x3e   :  { %357 = vmatprep.mubr.f32.mxu0 %v704_v1  ;;  %381 = vmatprep.mubr.f32.mxu1 %v704_v1  ;;  %v204_v7 = vld [vmem:[#allocation6 + $0xf8] sm:$0xff]  ;;  %v139_v10 = vld [vmem:[#allocation3 + $0xf0] sm:$0xff]  ;;  %v138_v12 = vld [vmem:[#allocation3 + $0xe8] sm:$0xff]  ;;  %s706_s28 = smov [#allocation12]  }
  0x3f   :  { %v777_v2 = vshrl.u32 %v99_v0, 7  ;;  %v203_v11 = vld [vmem:[#allocation6 + $0xf0] sm:$0xff]  ;;  %v202_v13 = vld [vmem:[#allocation6 + $0xe8] sm:$0xff]  ;;  %v137_v14 = vld [vmem:[#allocation3 + $0xe0] sm:$0xff]  ;;  %s512_s29 = sshll.u32 %s706_s28, 4  ;;  %vm503_vm0 = vcmp.lt.s32.totalorder %v99_v0, 256  ;;  %s513_s29 = int_to_ptr.vmem [resolvable:$true] %s512_s29 }
  0x40   :  { %v201_v15 = vld [vmem:[#allocation6 + $0xe0] sm:$0xff]  ;;  %v136_v20 = vld [vmem:[#allocation3 + $0xd8] sm:$0xff]  ;;  %v135_v22 = vld [vmem:[#allocation3 + $0xd0] sm:$0xff]  ;;  %s667_s30 = scalar_lea.vmem %s513_s29, 32  ;;  %p672_p12 = scmp.lt.s32.totalorder %s513_s29, %s513_s29 }
  0x41   :  { %v105_v3 = vsub.s32 1, %v777_v2  ;;  %v101_v4 = vsub.s32 0, %v777_v2  ;;  %v200_v21 = vld [vmem:[#allocation6 + $0xd8] sm:$0xff]  ;;  %v199_v25 = vld [vmem:[#allocation6 + $0xd0] sm:$0xff]  ;;  %v134_v26 = vld [vmem:[#allocation3 + $0xc8] sm:$0xff]  ;;  %p668_p11 = scmp.ne.s32.totalorder %s513_s29, %s667_s30  ;;  %p673_p13 = scmp.lt.s32.totalorder %s667_s30, %s667_s30 }
  0x42   :  { %v198_v31 = vld [vmem:[#allocation6 + $0xc8] sm:$0xff]  ;;  %v133_v32 = vld [vmem:[#allocation3 + $0xc0] sm:$0xff]  ;;  %v132_v38 = vld [vmem:[#allocation3 + $0xb8] sm:$0xff] }
  0x43   :  { %v784_v8 = vrot.slane %v97_v5, %v105_v3  ;;  %v786_v9 = vrot.slane %v97_v5, %v101_v4  ;;  %v197_v33 = vld [vmem:[#allocation6 + $0xc0] sm:$0xff]  ;;  %v131_v39 = vld [vmem:[#allocation3 + $0xb0] sm:$0xff]  ;;  %v196_v43 = vld [vmem:[#allocation6 + $0xb8] sm:$0xff]  ;;  %p674_p0 = por %p673_p13, %p672_p12 }
  0x44   :  { %v195_v44 = vld [vmem:[#allocation6 + $0xb0] sm:$0xff]  ;;  %v130_v45 = vld [vmem:[#allocation3 + $0xa8] sm:$0xff]  ;;  %v129_v50 = vld [vmem:[#allocation3 + $0xa0] sm:$0xff] }
  0x45   :  { %v172_v16 = vmul.f32 %v140_v6, %v784_v8  ;;  %v171_v17 = vmul.f32 %v139_v10, %v786_v9  ;;  %v170_v18 = vmul.f32 %v138_v12, %v784_v8  ;;  %v169_v19 = vmul.f32 %v137_v14, %v786_v9  ;;  %v194_v49 = vld [vmem:[#allocation6 + $0xa8] sm:$0xff]  ;;  %v128_v51 = vld [vmem:[#allocation3 + $0x98] sm:$0xff]  ;;  %v193_v56 = vld [vmem:[#allocation6 + $0xa0] sm:$0xff]  ;;  %p675_p1 = pnand %p674_p0, %p668_p11 }
  0x46   :  { %v168_v23 = vmul.f32 %v136_v20, %v784_v8  ;;  %v167_v24 = vmul.f32 %v135_v22, %v786_v9  ;;  %v166_v36 = vmul.f32 %v134_v26, %v784_v8  ;;  %v165_v37 = vmul.f32 %v133_v32, %v786_v9  ;;  %v127_v57 = vld [vmem:[#allocation3 + $0x90] sm:$0xff]  ;;  %v192_v61 = vld [vmem:[#allocation6 + $0x98] sm:$0xff]  ;;  %v126_v62 = vld [vmem:[#allocation3 + $0x88] sm:$0xff] }
  0x47   :  { %v236_v27 = vadd.f32 %v204_v7, %v172_v16  ;;  %v235_v28 = vadd.f32 %v203_v11, %v171_v17  ;;  %v234_v29 = vadd.f32 %v202_v13, %v170_v18  ;;  %v233_v30 = vadd.f32 %v201_v15, %v169_v19  ;;  %v191_v6 = vld [vmem:[#allocation6 + $0x90] sm:$0xff]  ;;  %v125_v7 = vld [vmem:[#allocation3 + $0x80] sm:$0xff]  ;;  %v190_v13 = vld [vmem:[#allocation6 + $0x88] sm:$0xff] }
  0x48   :  { %v232_v34 = vadd.f32 %v200_v21, %v168_v23  ;;  %v231_v35 = vadd.f32 %v199_v25, %v167_v24  ;;  %v230_v47 = vadd.f32 %v198_v31, %v166_v36  ;;  %v229_v48 = vadd.f32 %v197_v33, %v165_v37  ;;  %v124_v14 = vld [vmem:[#allocation3 + $0x78] sm:$0xff]  ;;  %v123_v15 = vld [vmem:[#allocation3 + $0x70] sm:$0xff]  ;;  %v189_v19 = vld [vmem:[#allocation6 + $0x80] sm:$0xff] }
  0x49   :  { %v268_v40 = vmax.f32 %v236_v27, 0.0  ;;  %v267_v41 = vmax.f32 %v235_v28, 0.0  ;;  %v266_v42 = vmax.f32 %v234_v29, 0.0  ;;  %v265_v46 = vmax.f32 %v233_v30, 0.0  ;;  %v122_v20 = vld [vmem:[#allocation3 + $0x68] sm:$0xff]  ;;  %v121_v21 = vld [vmem:[#allocation3 + $0x60] sm:$0xff] }
  0x4a   :  { %v264_v52 = vmax.f32 %v232_v34, 0.0  ;;  %v164_v53 = vmul.f32 %v132_v38, %v784_v8  ;;  %v163_v54 = vmul.f32 %v131_v39, %v786_v9  ;;  %v162_v55 = vmul.f32 %v130_v45, %v784_v8  ;;  %v188_v25 = vld [vmem:[#allocation6 + $0x78] sm:$0xff]  ;;  %v187_v31 = vld [vmem:[#allocation6 + $0x70] sm:$0xff]  ;;  %v186_v36 = vld [vmem:[#allocation6 + $0x68] sm:$0xff] }
  0x4b   :  { %293 = vmatprep.subr.mxu0 %v268_v40  ;;  %523 = vmatprep.subr.mxu1 %v268_v40  ;;  %v263_v58 = vmax.f32 %v231_v35, 0.0  ;;  %v161_v59 = vmul.f32 %v129_v50, %v786_v9  ;;  %v160_v60 = vmul.f32 %v128_v51, %v784_v8  ;;  %v262_v63 = vmax.f32 %v230_v47, 0.0  ;;  %v120_v26 = vld [vmem:[#allocation3 + $0x58] sm:$0xff]  ;;  %v119_v32 = vld [vmem:[#allocation3 + $0x50] sm:$0xff]  ;;  %v118_v38 = vld [vmem:[#allocation3 + $0x48] sm:$0xff] }
  0x4c   :  { %294 = vmatpush1.msra.mxu0 %v267_v41  ;;  %539 = vmatpush1.msra.mxu1 %v267_v41  ;;  %v228_v3 = vadd.f32 %v196_v43, %v164_v53  ;;  %v227_v4 = vadd.f32 %v195_v44, %v163_v54  ;;  %v226_v5 = vadd.f32 %v194_v49, %v162_v55  ;;  %v261_v10 = vmax.f32 %v229_v48, 0.0  ;;  %v185_v41 = vld [vmem:[#allocation6 + $0x60] sm:$0xff]  ;;  %v116_v48 = vld [vmem:[#allocation3 + $0x38] sm:$0xff]  ;;  %v183_v51 = vld [vmem:[#allocation6 + $0x50] sm:$0xff] }
  0x4d   :  { %295 = vmatprep.subr.mxu0 %v266_v42  ;;  %524 = vmatprep.subr.mxu1 %v266_v42  ;;  %v225_v11 = vadd.f32 %v193_v56, %v161_v59  ;;  %v159_v12 = vmul.f32 %v127_v57, %v786_v9  ;;  %v224_v17 = vadd.f32 %v192_v61, %v160_v60  ;;  %v117_v43 = vld [vmem:[#allocation3 + $0x40] sm:$0xff]  ;;  %v115_v53 = vld [vmem:[#allocation3 + $0x30] sm:$0xff]  ;;  %v182_v56 = vld [vmem:[#allocation6 + $0x48] sm:$0xff] }
  0x4e   :  { %296 = vmatpush1.msra.mxu0 %v265_v46  ;;  %540 = vmatpush1.msra.mxu1 %v265_v46  ;;  %v260_v16 = vmax.f32 %v228_v3, 0.0  ;;  %v158_v18 = vmul.f32 %v126_v62, %v784_v8  ;;  %v259_v22 = vmax.f32 %v227_v4, 0.0  ;;  %v157_v24 = vmul.f32 %v125_v7, %v786_v9  ;;  %v184_v46 = vld [vmem:[#allocation6 + $0x58] sm:$0xff]  ;;  %v181_v61 = vld [vmem:[#allocation6 + $0x40] sm:$0xff] }
  0x4f   :  { %297 = vmatprep.subr.mxu0 %v264_v52  ;;  %525 = vmatprep.subr.mxu1 %v264_v52  ;;  %v223_v23 = vadd.f32 %v191_v6, %v159_v12  ;;  %v258_v27 = vmax.f32 %v226_v5, 0.0  ;;  %v156_v29 = vmul.f32 %v124_v14, %v784_v8  ;;  %v155_v30 = vmul.f32 %v123_v15, %v786_v9  ;;  %v180_v5 = vld [vmem:[#allocation6 + $0x38] sm:$0xff]  ;;  %v179_v12 = vld [vmem:[#allocation6 + $0x30] sm:$0xff] }
  0x50   :  { %298 = vmatpush1.msra.mxu0 %v263_v58  ;;  %541 = vmatpush1.msra.mxu1 %v263_v58  ;;  %v222_v28 = vadd.f32 %v190_v13, %v158_v18  ;;  %v257_v33 = vmax.f32 %v225_v11, 0.0  ;;  %v221_v34 = vadd.f32 %v189_v19, %v157_v24  ;;  %v154_v35 = vmul.f32 %v122_v20, %v784_v8  ;;  %v114_v58 = vld [vmem:[#allocation3 + $0x28] sm:$0xff]  ;;  %v112_v7 = vld [vmem:[#allocation3 + $0x18] sm:$0xff]  ;;  %v111_v14 = vld [vmem:[#allocation3 + $0x10] sm:$0xff] }
  0x51   :  { %299 = vmatprep.subr.mxu0 %v262_v63  ;;  %526 = vmatprep.subr.mxu1 %v262_v63  ;;  %v153_v37 = vmul.f32 %v121_v21, %v786_v9  ;;  %v256_v39 = vmax.f32 %v224_v17, 0.0  ;;  %v220_v40 = vadd.f32 %v188_v25, %v156_v29  ;;  %v152_v42 = vmul.f32 %v120_v26, %v784_v8  ;;  %v113_v63 = vld [vmem:[#allocation3 + $0x20] sm:$0xff]  ;;  %v178_v17 = vld [vmem:[#allocation6 + $0x28] sm:$0xff] }
  0x52   :  { %300 = vmatpush1.msra.mxu0 %v261_v10  ;;  %542 = vmatpush1.msra.mxu1 %v261_v10  ;;  %v255_v44 = vmax.f32 %v223_v23, 0.0  ;;  %v219_v45 = vadd.f32 %v187_v31, %v155_v30  ;;  %v151_v47 = vmul.f32 %v119_v32, %v786_v9  ;;  %v254_v49 = vmax.f32 %v222_v28, 0.0  ;;  %v110_v19 = vld [vmem:[#allocation3 + $0x8] sm:$0xff]  ;;  %v109_v24 = vld [vmem:[#allocation3] sm:$0xff]  ;;  %v175_v31 = vld [vmem:[#allocation6 + $0x10] sm:$0xff] }
  0x53   :  { %301 = vmatprep.subr.mxu0 %v260_v16  ;;  %527 = vmatprep.subr.mxu1 %v260_v16  ;;  %v218_v50 = vadd.f32 %v186_v36, %v154_v35  ;;  %v150_v52 = vmul.f32 %v118_v38, %v784_v8  ;;  %v253_v54 = vmax.f32 %v221_v34, 0.0  ;;  %v217_v55 = vadd.f32 %v185_v41, %v153_v37  ;;  %v174_v35 = vld [vmem:[#allocation6 + $0x8] sm:$0xff] }
  0x54   :  { %302 = vmatpush1.msra.mxu0 %v259_v22  ;;  %543 = vmatpush1.msra.mxu1 %v259_v22  ;;  %v149_v57 = vmul.f32 %v117_v43, %v786_v9  ;;  %v252_v59 = vmax.f32 %v220_v40, 0.0  ;;  %v216_v60 = vadd.f32 %v184_v46, %v152_v42  ;;  %v148_v62 = vmul.f32 %v116_v48, %v784_v8  ;;  %v177_v22 = vld [vmem:[#allocation6 + $0x20] sm:$0xff] }
  0x55   :  { %303 = vmatprep.subr.mxu0 %v258_v27  ;;  %528 = vmatprep.subr.mxu1 %v258_v27  ;;  %v251_v3 = vmax.f32 %v219_v45, 0.0  ;;  %v215_v4 = vadd.f32 %v183_v51, %v151_v47  ;;  %v147_v6 = vmul.f32 %v115_v53, %v786_v9  ;;  %v250_v10 = vmax.f32 %v218_v50, 0.0  ;;  %v176_v27 = vld [vmem:[#allocation6 + $0x18] sm:$0xff]  ;;  %v269_v48 = vld [vmem:[#allocation8] sm:$0xff]  ;;  %v270_v50 = vld [vmem:[#allocation8 + $0x8] sm:$0xff] }
  0x56   :  { %304 = vmatpush1.msra.mxu0 %v257_v33  ;;  %544 = vmatpush1.msra.mxu1 %v257_v33  ;;  %v214_v11 = vadd.f32 %v182_v56, %v150_v52  ;;  %v146_v13 = vmul.f32 %v114_v58, %v784_v8  ;;  %v249_v15 = vmax.f32 %v217_v55, 0.0  ;;  %v213_v16 = vadd.f32 %v181_v61, %v149_v57  ;;  %v274_v51 = vld [vmem:[#allocation8 + $0x28] sm:$0xff]  ;;  %v271_v52 = vld [vmem:[#allocation8 + $0x10] sm:$0xff]  ;;  %v276_v55 = vld [vmem:[#allocation8 + $0x38] sm:$0xff] }
  0x57   :  { %305 = vmatprep.subr.mxu0 %v256_v39  ;;  %529 = vmatprep.subr.mxu1 %v256_v39  ;;  %v145_v18 = vmul.f32 %v113_v63, %v786_v9  ;;  %v248_v20 = vmax.f32 %v216_v60, 0.0  ;;  %v212_v21 = vadd.f32 %v180_v5, %v148_v62  ;;  %v144_v23 = vmul.f32 %v112_v7, %v784_v8  ;;  %v173_v39 = vld [vmem:[#allocation6] sm:$0xff]  ;;  %v275_v53 = vld [vmem:[#allocation8 + $0x30] sm:$0xff]  ;;  %v278_v62 = vld [vmem:[#allocation9 + $0x8] sm:$0xff] }
  0x58   :  { %306 = vmatpush1.msra.mxu0 %v255_v44  ;;  %545 = vmatpush1.msra.mxu1 %v255_v44  ;;  %v247_v25 = vmax.f32 %v215_v4, 0.0  ;;  %v211_v26 = vadd.f32 %v179_v12, %v147_v6  ;;  %v143_v28 = vmul.f32 %v111_v14, %v786_v9  ;;  %v246_v29 = vmax.f32 %v214_v11, 0.0  ;;  %v277_v58 = vld [vmem:[#allocation9] sm:$0xff]  ;;  %v279_v60 = vld [vmem:[#allocation9 + $0x10] sm:$0xff]  ;;  %v280_v4 = vld [vmem:[#allocation9 + $0x18] sm:$0xff] }
  0x59   :  { %307 = vmatprep.subr.mxu0 %v254_v49  ;;  %530 = vmatprep.subr.mxu1 %v254_v49  ;;  %v210_v30 = vadd.f32 %v178_v17, %v146_v13  ;;  %v142_v32 = vmul.f32 %v110_v19, %v784_v8  ;;  %v245_v33 = vmax.f32 %v213_v16, 0.0  ;;  %v209_v34 = vadd.f32 %v177_v22, %v145_v18  ;;  %v273_v49 = vld [vmem:[#allocation8 + $0x20] sm:$0xff]  ;;  %v424_v17 = vld [vmem:[#allocation11 + $0x10] sm:$0xff]  ;;  %v423_v22 = vld [vmem:[#allocation11 + $0x8] sm:$0xff] }
  0x5a   :  { %308 = vmatpush1.msra.mxu0 %v253_v54  ;;  %546 = vmatpush1.msra.mxu1 %v253_v54  ;;  %v141_v36 = vmul.f32 %v109_v24, %v786_v9  ;;  %v244_v37 = vmax.f32 %v212_v21, 0.0  ;;  %v208_v38 = vadd.f32 %v176_v27, %v144_v23  ;;  %v243_v40 = vmax.f32 %v211_v26, 0.0  ;;  %v272_v54 = vld [vmem:[#allocation8 + $0x18] sm:$0xff]  ;;  %v285_v7 = vld [vmem:[#allocation9 + $0x40] sm:$0xff]  ;;  %v287_v26 = vld [vmem:[#allocation9 + $0x50] sm:$0xff] }
  0x5b   :  { %309 = vmatprep.subr.mxu0 %v252_v59  ;;  %531 = vmatprep.subr.mxu1 %v252_v59  ;;  %v207_v41 = vadd.f32 %v175_v31, %v143_v28  ;;  %v242_v42 = vmax.f32 %v210_v30, 0.0  ;;  %v206_v8 = vadd.f32 %v174_v35, %v142_v32  ;;  %v241_v43 = vmax.f32 %v209_v34, 0.0  ;;  %v281_v12 = vld [vmem:[#allocation9 + $0x20] sm:$0xff]  ;;  %v425_v28 = vld [vmem:[#allocation11 + $0x18] sm:$0xff]  ;;  %v283_v31 = vld [vmem:[#allocation9 + $0x30] sm:$0xff] }
  0x5c   :  { %310 = vmatpush1.msra.mxu0 %v251_v3  ;;  %547 = vmatpush1.msra.mxu1 %v251_v3  ;;  %v205_v44 = vadd.f32 %v173_v39, %v141_v36  ;;  %v240_v45 = vmax.f32 %v208_v38, 0.0  ;;  %v422_v16 = vld [vmem:[#allocation11] sm:$0xff]  ;;  %v288_v36 = vld [vmem:[#allocation9 + $0x58] sm:$0xff]  ;;  %v291_v38 = vld [vmem:[#allocation9 + $0x70] sm:$0xff] }
  0x5d   :  { %311 = vmatprep.subr.mxu0 %v250_v10  ;;  %532 = vmatprep.subr.mxu1 %v250_v10  ;;  %v239_v9 = vmax.f32 %v207_v41, 0.0  ;;  %v238_v46 = vmax.f32 %v206_v8, 0.0 }
  0x5e   :  { %312 = vmatpush1.msra.mxu0 %v249_v15  ;;  %548 = vmatpush1.msra.mxu1 %v249_v15  ;;  %v237_v47 = vmax.f32 %v205_v44, 0.0  ;;  %v284_v44 = vld [vmem:[#allocation9 + $0x38] sm:$0xff] }
  0x5f   :  { %313 = vmatprep.subr.mxu0 %v248_v20  ;;  %533 = vmatprep.subr.mxu1 %v248_v20  ;;  %v282_v20 = vld [vmem:[#allocation9 + $0x28] sm:$0xff] }
  0x60   :  { %314 = vmatpush1.msra.mxu0 %v247_v25  ;;  %549 = vmatpush1.msra.mxu1 %v247_v25  ;;  %v286_v25 = vld [vmem:[#allocation9 + $0x48] sm:$0xff] }
  0x61   :  { %315 = vmatprep.subr.mxu0 %v246_v29  ;;  %534 = vmatprep.subr.mxu1 %v246_v29  ;;  %v426_v29 = vld [vmem:[#allocation11 + $0x20] sm:$0xff] }
  0x62   :  { %316 = vmatpush1.msra.mxu0 %v245_v33  ;;  %550 = vmatpush1.msra.mxu1 %v245_v33 }
  0x63   :  { %317 = vmatprep.subr.mxu0 %v244_v37  ;;  %535 = vmatprep.subr.mxu1 %v244_v37  ;;  %v289_v37 = vld [vmem:[#allocation9 + $0x60] sm:$0xff] }
  0x64   :  { %318 = vmatpush1.msra.mxu0 %v243_v40  ;;  %551 = vmatpush1.msra.mxu1 %v243_v40 }
  0x65   :  { %319 = vmatprep.subr.mxu0 %v242_v42  ;;  %536 = vmatprep.subr.mxu1 %v242_v42  ;;  %v427_v42 = vld [vmem:[#allocation11 + $0x28] sm:$0xff] }
  0x66   :  { %320 = vmatpush1.msra.mxu0 %v241_v43  ;;  %552 = vmatpush1.msra.mxu1 %v241_v43 }
  0x67   :  { %321 = vmatprep.subr.mxu0 %v240_v45  ;;  %537 = vmatprep.subr.mxu1 %v240_v45 }
  0x68   :  { %322 = vmatpush1.msra.mxu0 %v239_v9  ;;  %553 = vmatpush1.msra.mxu1 %v239_v9 }
  0x69   :  { %323 = vmatprep.subr.mxu0 %v238_v46  ;;  %538 = vmatprep.subr.mxu1 %v238_v46 }
  0x6a   :  { %324 = vmatpush1.msra.mxu0 %v237_v47  ;;  %554 = vmatpush1.msra.mxu1 %v237_v47 }
  0x6b   :  { %358 = vmatmul.mubr.f32.vlgmr.msra.gmra.mxu0 %v269_v48  ;;  %382 = vmatmul.mubr.f32.vlgmr.msra.gmra.mxu1 %v273_v49  ;;  %v290_v49 = vld [vmem:[#allocation9 + $0x68] sm:$0xff] }
  0x6c   :  { %363 = vmatprep.mubr.f32.mxu0 %v704_v1  ;;  %387 = vmatprep.mubr.f32.mxu1 %v704_v1 }
  0x6f   :  { %364 = vmatmul.mubr.f32.gmra.mxu0 %v270_v50  ;;  %388 = vmatmul.mubr.f32.gmra.mxu1 %v274_v51  ;;  %v428_v51 = vld [vmem:[#allocation11 + $0x30] sm:$0xff] }
  0x70   :  { %369 = vmatprep.mubr.f32.mxu0 %v704_v1  ;;  %393 = vmatprep.mubr.f32.mxu1 %v704_v1 }
  0x73   :  { %370 = vmatmul.mubr.f32.gmra.mxu0 %v271_v52  ;;  %394 = vmatmul.mubr.f32.gmra.mxu1 %v275_v53 }
  0x74   :  { %375 = vmatprep.mubr.f32.mxu0 %v704_v1  ;;  %399 = vmatprep.mubr.f32.mxu1 %v704_v1 }
  0x77   :  { %376 = vmatmul.mubr.f32.gmra.mxu0 %v272_v54  ;;  %400 = vmatmul.mubr.f32.gmra.mxu1 %v276_v55 }
 0x12b   :  { %v359_v56 = vpop.f32.mrf.mxu0  ;;  %v383_v57 = vpop.f32.mrf.mxu1 }
 0x12c   :  { %v360_v63 = vadd.f32 %v359_v56, %v277_v58  ;;  %v384_v18 = vadd.f32 %v383_v57, %v285_v7  ;;  %v430_v57 = vld [vmem:[#allocation11 + $0x40] sm:$0xff] }
 0x12d   :  { %v361_v59 = vpop.f32.mrf.mxu0  ;;  %v385_v61 = vpop.f32.mrf.mxu1 }
 0x12e   :  { %v362_v10 = vadd.f32 %v361_v59, %v278_v62  ;;  %v406_v15 = vmax.f32 %v360_v63, 0.0  ;;  %v414_v40 = vmax.f32 %v384_v18, 0.0  ;;  %v386_v41 = vadd.f32 %v385_v61, %v286_v25  ;;  %v429_v63 = vld [vmem:[#allocation11 + $0x38] sm:$0xff] }
 0x12f   :  { %v365_v3 = vpop.f32.mrf.mxu0  ;;  %v389_v5 = vpop.f32.mrf.mxu1 }
 0x130   :  { %v366_v6 = vadd.f32 %v365_v3, %v279_v60  ;;  %v407_v27 = vmax.f32 %v362_v10, 0.0  ;;  %v438_v39 = vmul.f32 %v422_v16, %v406_v15  ;;  %v390_v8 = vadd.f32 %v389_v5, %v287_v26  ;;  %v431_v10 = vld [vmem:[#allocation11 + $0x48] sm:$0xff] }
 0x131   :  { %v367_v11 = vpop.f32.mrf.mxu0  ;;  %v391_v1 = vpop.f32.mrf.mxu1  ;;  %v415_v61 = vmax.f32 %v386_v41, 0.0 }
 0x132   :  { %v408_v13 = vmax.f32 %v366_v6, 0.0  ;;  %v368_v14 = vadd.f32 %v367_v11, %v280_v4  ;;  %v439_v50 = vmul.f32 %v423_v22, %v407_v27  ;;  %v392_v52 = vadd.f32 %v391_v1, %v288_v36  ;;  %v292_v4 = vld [vmem:[#allocation9 + $0x78] sm:$0xff] }
 0x133   :  { %v371_v19 = vpop.f32.mrf.mxu0  ;;  %v395_v21 = vpop.f32.mrf.mxu1  ;;  %v416_v62 = vmax.f32 %v390_v8, 0.0  ;;  %v446_v1 = vmul.f32 %v430_v57, %v414_v40  ;;  %v437_v36 = vld [vmem:[#allocation11 + $0x78] sm:$0xff] }
 0x134   :  { %v409_v23 = vmax.f32 %v368_v14, 0.0  ;;  %v372_v24 = vadd.f32 %v371_v19, %v281_v12  ;;  %v440_v33 = vmul.f32 %v424_v17, %v408_v13  ;;  %v396_v54 = vadd.f32 %v395_v21, %v289_v37  ;;  %v432_v13 = vld [vmem:[#allocation11 + $0x50] sm:$0xff]  ;;  %v433_v19 = vld [vmem:[#allocation11 + $0x58] sm:$0xff]  ;;  %v434_v21 = vld [vmem:[#allocation11 + $0x60] sm:$0xff] }
 0x135   :  { %v373_v30 = vpop.f32.mrf.mxu0  ;;  %v397_v32 = vpop.f32.mrf.mxu1  ;;  %v417_v14 = vmax.f32 %v392_v52, 0.0  ;;  %v448_v25 = vmul.f32 %v432_v13, %v416_v62 }
 0x136   :  { %v410_v34 = vmax.f32 %v372_v24, 0.0  ;;  %v374_v35 = vadd.f32 %v373_v30, %v282_v20  ;;  %v441_v9 = vmul.f32 %v425_v28, %v409_v23  ;;  %v454_v56 = vadd.f32 %v440_v33, %v438_v39  ;;  %v436_v24 = vld [vmem:[#allocation11 + $0x70] sm:$0xff] }
 0x137   :  { %v377_v43 = vpop.f32.mrf.mxu0  ;;  %v401_v45 = vpop.f32.mrf.mxu1  ;;  %v398_v3 = vadd.f32 %v397_v32, %v290_v49  ;;  %v418_v15 = vmax.f32 %v396_v54, 0.0  ;;  %v447_v23 = vmul.f32 %v431_v10, %v415_v61  ;;  %v705_v49 = vmov 1966171168  }
 0x138   :  { %v442_v46 = vmul.f32 %v426_v29, %v410_v34  ;;  %v411_v47 = vmax.f32 %v374_v35, 0.0  ;;  %v378_v48 = vadd.f32 %v377_v43, %v283_v31  ;;  %v402_v55 = vadd.f32 %v401_v45, %v291_v38  ;;  %v435_v31 = vld [vmem:[#allocation11 + $0x68] sm:$0xff] }
 0x139   :  { %v379_v53 = vpop.f32.mrf.mxu0  ;;  %v403_v5 = vpop.f32.mrf.mxu1  ;;  %v467_v6 = vadd.f32 %v441_v9, %v439_v50  ;;  %v419_v28 = vmax.f32 %v398_v3, 0.0  ;;  %v449_v29 = vmul.f32 %v433_v19, %v417_v14  ;;  %v450_v30 = vmul.f32 %v434_v21, %v418_v15 }
 0x13a   :  { %v443_v58 = vmul.f32 %v427_v42, %v411_v47  ;;  %v412_v59 = vmax.f32 %v378_v48, 0.0  ;;  %v380_v60 = vadd.f32 %v379_v53, %v284_v44  ;;  %v455_v7 = vadd.f32 %v454_v56, %v442_v46 }
 0x13b   :  { %v420_v16 = vmax.f32 %v402_v55, 0.0  ;;  %v404_v22 = vadd.f32 %v403_v5, %v292_v4  ;;  %v451_v38 = vmul.f32 %v435_v31, %v419_v28  ;;  %v487_v50 = vunpack.c.l.s4 %v705_v49 }
 0x13c   :  { %v444_v11 = vmul.f32 %v428_v51, %v412_v59  ;;  %v413_v12 = vmax.f32 %v380_v60, 0.0  ;;  %v468_v17 = vadd.f32 %v467_v6, %v443_v58  ;;  %v480_v56 = vstv %s840_s6 }
 0x13d   :  { %v452_v34 = vmul.f32 %v436_v24, %v420_v16  ;;  %v421_v35 = vmax.f32 %v404_v22, 0.0  ;;  %v488_v55 = vunpack.c.0.s8 %v487_v50 }
 0x13e   :  { %v456_v18 = vadd.f32 %v455_v7, %v444_v11  ;;  %v445_v20 = vmul.f32 %v429_v63, %v413_v12 }
 0x13f   :  { %v453_v42 = vmul.f32 %v437_v36, %v421_v35  ;;  %v491_v60 = vsub.s32 %v488_v55, %v777_v2 }
 0x140   :  { %v457_v26 = vadd.f32 %v456_v18, %v446_v1  ;;  %v469_v27 = vadd.f32 %v468_v17, %v445_v20 }
 0x142   :  { %v470_v32 = vadd.f32 %v469_v27, %v447_v23  ;;  %v458_v33 = vadd.f32 %v457_v26, %v448_v25 }
 0x144   :  { %v459_v37 = vadd.f32 %v458_v33, %v450_v30  ;;  %v471_v39 = vadd.f32 %v470_v32, %v449_v29 }
 0x146   :  { %v472_v40 = vadd.f32 %v471_v39, %v451_v38  ;;  %v460_v41 = vadd.f32 %v459_v37, %v452_v34 }
 0x148   :  { %v461_v8 = vrot.slane %v460_v41, 4  ;;  %v473_v43 = vadd.f32 %v472_v40, %v453_v42 }
 0x14a   :  { %v462_v44 = vadd.f32 %v461_v8, %v460_v41  ;;  %v474_v45 = vrot.slane %v473_v43, 4 }
 0x14c   :  { %v463_v9 = vrot.slane %v462_v44, 2  ;;  %v475_v46 = vadd.f32 %v474_v45, %v473_v43 }
 0x14e   :  { %v464_v47 = vadd.f32 %v463_v9, %v462_v44  ;;  %v476_v48 = vrot.slane %v475_v46, 2 }
 0x150   :  { %v465_v51 = vrot.slane %v464_v47, 1  ;;  %v477_v52 = vadd.f32 %v476_v48, %v475_v46 }
 0x152   :  { %v466_v53 = vadd.f32 %v465_v51, %v464_v47  ;;  %v478_v54 = vrot.slane %v477_v52, 1 }
 0x154   :  { %v479_v57 = vadd.f32 %v478_v54, %v477_v52  ;;  %v481_v58 = vadd.f32 %v480_v56, %v466_v53 }
 0x156   :  { %v482_v59 = vadd.f32 %v480_v56, %v479_v57 }
 0x158   :  { %v485_v61 = vcombine.low %v481_v58, %v482_v59 }
 0x15a   :  { %v492_v62 = vrot.slane %v485_v61, %v491_v60 }
 0x15c   :  { %v499_v63 = vrot.slane %v492_v62, %v491_v60 }
 0x15e   :  { %505 = vst.msk [vmem:[#allocation12] sm:$0x3] %vm503_vm0, %v499_v63 }
 0x15f   :  { %678 = shalt.err (!%p675_p1)
}
 0x160   :  { %515 = dma.vmem_to_hbm [thread:$0]  %s513_s29, 32, %s841_s7, [#allocation5]  }
 0x161   :  { %693 = dma.done.wait [#allocation5], 32  }
 0x162   :  { %694 = vsyncadd [#allocation5], 4294967264 }
 0x163   :  { %519 = vsyncpa [#allocation4], 1 }
 0x164   :  { %520 = vsyncpa [#allocation7], 1 }
 0x165   :  { %521 = vsyncpa [#allocation10], 1 }
 0x166   :  { %522 = vsyncpa [#allocation5], 1 }

</bundles_post_ra>
